<compile_context>
chip_gen: v7x
topology: tpu7x:2x2x1
jax: 0.10.0
libtpu: 0.0.40
codegen_flags: <defaults>
</compile_context>

<pallas_src>
import jax
import jax.numpy as jnp
from jax.experimental import pallas as pl
from jax.experimental.pallas import tpu as pltpu


# ----------------------------------------------------------------------------
# Pallas kernel: rational function P(x)/Q(x)
# ----------------------------------------------------------------------------
def _kat_rational_kernel(num_ref, x_ref, den_ref, o_ref):
    # num_ref: (6,)              SMEM   numerator coefficients a0..a5 (shared by all channels)
    # x_ref:   (row_tile, dt)    VMEM   input tile
    # den_ref: (4, dt)           VMEM   per-channel |b1|..|b4| (group structure pre-baked)
    # o_ref:   (row_tile, dt)    VMEM   output tile
    x = x_ref[...].astype(jnp.float32)

    # Per-channel denominator coefficient rows as 2-D (1, dt) views (static slices on the
    # ref are free; keeps everything in native (sublane, lane) layout).
    b1 = den_ref[0:1, :]
    b2 = den_ref[1:2, :]
    b3 = den_ref[2:3, :]
    b4 = den_ref[3:4, :]

    # Numerator: degree-5 Horner, scalar (SMEM) coefficients broadcast by the VPU.
    p = x * num_ref[5] + num_ref[4]
    p = p * x + num_ref[3]
    p = p * x + num_ref[2]
    p = p * x + num_ref[1]
    p = p * x + num_ref[0]

    # Denominator: Q(x) = 1 + |b1| x + |b2| x^2 + |b3| x^3 + |b4| x^4
    # degree-4 Horner; the constant term is folded in as a literal.
    q = x * b4 + b3
    q = q * x + b2
    q = q * x + b1
    q = q * x + 1.0

    # Divide on the EUP: approximate reciprocal + one Newton-Raphson refinement.
    r = pl.reciprocal(q, approx=True)
    r = r * (2.0 - q * r)
    o_ref[...] = (p * r).astype(o_ref.dtype)


# ----------------------------------------------------------------------------
# Tiling heuristics
# ----------------------------------------------------------------------------
def _pick_d_tile(D):
    # Prefer a lane-dense (multiple-of-128) channel tile; otherwise fall back to the full
    # channel extent (always a legal block: last block dim equals the array dim).
    if D % 128 != 0 or D <= 1024:
        return D
    for cand in (1024, 512, 256, 128):
        if D % cand == 0:
            return cand
    return D


def _pick_row_tile(n_rows, d_tile, itemsize, target_block_bytes=2 * 1024 * 1024):
    sublane_min = 8 if itemsize >= 4 else 16          # bf16/fp8 need >=16 sublanes
    rt = target_block_bytes // max(1, d_tile * itemsize)
    rt = max(sublane_min, (rt // sublane_min) * sublane_min)
    rt = min(rt, 1024)
    # Don't tile wider than the (rounded-up) number of rows we actually have.
    rows_rounded = ((n_rows + sublane_min - 1) // sublane_min) * sublane_min
    rt = min(rt, max(sublane_min, rows_rounded))
    return rt


# ----------------------------------------------------------------------------
# Wrapper: parameter expansion (glue) + pallas_call
# ----------------------------------------------------------------------------
def kat_group_forward(x, weight_numerator, weight_denominator, num_groups):
    """x: (B, L, D) float32/bfloat16.  weight_numerator: (1, 6).  weight_denominator: (G, 4)."""
    B, L, D = x.shape
    assert D % num_groups == 0
    d_per_group = D // num_groups

    # Numerator is identical for every group/channel (torch forward() repeats it):
    # pass the 6 coefficients as SMEM scalars.
    num_coefs = weight_numerator.reshape(-1).astype(jnp.float32)            # (6,)

    # Per-channel |denominator| coefficient table, shape (4, D):
    # channel d belongs to group d // d_per_group; rows are |b1|..|b4|.
    group_of_channel = jnp.arange(D) // d_per_group                          # (D,)
    den_per_channel = jnp.abs(weight_denominator.astype(jnp.float32))[group_of_channel].T  # (4, D)

    # Flatten (B, L, D) -> (B*L, D); rows on sublanes, channels on lanes.
    n_rows = B * L
    x2d = x.reshape(n_rows, D)

    itemsize = jnp.dtype(x.dtype).itemsize
    d_tile = _pick_d_tile(D)
    row_tile = _pick_row_tile(n_rows, d_tile, itemsize)

    # Pad rows to a multiple of row_tile (padded rows compute a0/1 and are sliced off).
    n_row_tiles = pl.cdiv(n_rows, row_tile)
    padded_rows = n_row_tiles * row_tile
    if padded_rows != n_rows:
        x2d = jnp.pad(x2d, ((0, padded_rows - n_rows), (0, 0)))
    n_d_tiles = D // d_tile

    # Explicit VMEM budget: double-buffered in/out blocks + coefficient table + headroom.
    block_bytes = row_tile * d_tile * itemsize
    den_bytes = 4 * d_tile * 4
    vmem_needed = 2 * (2 * block_bytes) + 2 * den_bytes
    vmem_limit = int(min(32 * 1024 * 1024, max(2 * vmem_needed, 16 * 1024 * 1024)))

    out2d = pl.pallas_call(
        _kat_rational_kernel,
        out_shape=jax.ShapeDtypeStruct((padded_rows, D), x.dtype),
        grid_spec=pltpu.PrefetchScalarGridSpec(
            num_scalar_prefetch=0,
            # Channel tiles outer, row tiles inner -> the (4, d_tile) coefficient block
            # index is constant along the inner loop.
            grid=(n_d_tiles, n_row_tiles),
            in_specs=[
                pl.BlockSpec(memory_space=pltpu.MemorySpace.SMEM),        # numerator scalars
                pl.BlockSpec((row_tile, d_tile), lambda j, i: (i, j)),    # x tile
                pl.BlockSpec((4, d_tile), lambda j, i: (0, j)),           # |den| coefs per d tile
            ],
            out_specs=pl.BlockSpec((row_tile, d_tile), lambda j, i: (i, j)),
        ),
        compiler_params=pltpu.CompilerParams(
            dimension_semantics=("parallel", "parallel"),
            vmem_limit_bytes=vmem_limit,
        ),
    )(num_coefs, x2d, den_per_channel)

    return out2d[:n_rows].reshape(B, L, D)


# ----------------------------------------------------------------------------
# Pure-JAX reference (mirrors Rational_CUDA_A_1DGroup) for a correctness check
# ----------------------------------------------------------------------------
def _kat_group_ref(x, weight_numerator, weight_denominator, num_groups):
    B, L, D = x.shape
    d_per_group = D // num_groups
    len_num = weight_numerator.shape[1]
    len_deno = weight_denominator.shape[1]
    wn = jnp.tile(weight_numerator, (num_groups, 1))
    z = x.reshape(B, L, num_groups, d_per_group).transpose(2, 0, 1, 3).reshape(num_groups, -1)
    xps = [jnp.ones_like(z), z]
    for _ in range(max(len_num, len_deno) - 2):
        xps.append(xps[-1] * z)
    xps = jnp.stack(xps, axis=1)                                        # (G, 6, N)
    numerator = jnp.einsum('gk,gkn->gn', wn, xps)
    expanded_dw = jnp.concatenate(
        [jnp.ones((num_groups, 1), jnp.float32),
         weight_denominator,
         jnp.zeros((num_groups, max(0, len_num - len_deno - 1)), jnp.float32)], axis=1)
    denominator = jnp.einsum('gk,gkn->gn', jnp.abs(expanded_dw), xps)
    result = (numerator / denominator).reshape(num_groups, B, L, d_per_group)
    return result.transpose(1, 2, 0, 3).reshape(B, L, D)


if __name__ == "__main__":
    # Deterministic "gelu"-style rational initialization (order (5, 4)),
    # replacing the JSON-file load of the torch module.
    NUM_GROUPS = 8
    weight_numerator = jnp.array(
        [[-0.0012423594497499122, 0.5080497063245629, 0.41586363182937475,
          0.13022718688035761, 0.024355900098993424, 0.00290283948155535]],
        dtype=jnp.float32)                                              # (1, 6)
    weight_denominator = jnp.tile(
        jnp.array([[-0.06675015696494944, 0.17927646217001553,
                    0.03746682605496631, 1.6561610853276082e-10]], dtype=jnp.float32),
        (NUM_GROUPS, 1))                                                # (8, 4)

    # Small input consistent with the forward contract: (batch, length, channels)
    B, L, D = 2, 8, 32
    key = jax.random.PRNGKey(0)
    x = jax.random.normal(key, (B, L, D), dtype=jnp.float32)

    out = kat_group_forward(x, weight_numerator, weight_denominator, NUM_GROUPS)
    out = jax.block_until_ready(out)

    ref = _kat_group_ref(x, weight_numerator, weight_denominator, NUM_GROUPS)
    assert out.shape == (B, L, D)
    assert jnp.allclose(out, ref, atol=2e-5, rtol=2e-5), "mismatch vs reference"

    print("KERNEL_OK")
</pallas_src>

<mosaic_0001>
module attributes {stable_mosaic.version = 11 : i64} {
  func.func @_kat_rational_kernel(%arg0: i32, %arg1: i32, %arg2: memref<6xf32, #tpu.memory_space<smem>>, %arg3: memref<16x32xf32, #tpu.memory_space<vmem>>, %arg4: memref<4x32xf32, #tpu.memory_space<vmem>>, %arg5: memref<16x32xf32, #tpu.memory_space<vmem>>) attributes {dimension_semantics = [#tpu.dimension_semantics<parallel>, #tpu.dimension_semantics<parallel>], iteration_bounds = array<i64: 1, 1>, scalar_prefetch = 0 : i64, scratch_operands = 0 : i64, tpu.core_type = #tpu.core_type<tc>, window_params = [{transform_indices = @transform_0, window_bounds = array<i64: 6>}, {transform_indices = @transform_1, window_bounds = array<i64: 16, 32>}, {transform_indices = @transform_2, window_bounds = array<i64: 4, 32>}, {transform_indices = @transform_3, window_bounds = array<i64: 16, 32>}]} {
    %c0 = arith.constant 0 : index
    %c0_0 = arith.constant 0 : index
    %0 = vector.load %arg3[%c0, %c0_0] : memref<16x32xf32, #tpu.memory_space<vmem>>, vector<16x32xf32>
    %c0_1 = arith.constant 0 : index
    %c0_2 = arith.constant 0 : index
    %1 = vector.load %arg4[%c0_1, %c0_2] : memref<4x32xf32, #tpu.memory_space<vmem>>, vector<1x32xf32>
    %c1 = arith.constant 1 : index
    %c0_3 = arith.constant 0 : index
    %2 = vector.load %arg4[%c1, %c0_3] : memref<4x32xf32, #tpu.memory_space<vmem>>, vector<1x32xf32>
    %c2 = arith.constant 2 : index
    %c0_4 = arith.constant 0 : index
    %3 = vector.load %arg4[%c2, %c0_4] : memref<4x32xf32, #tpu.memory_space<vmem>>, vector<1x32xf32>
    %c3 = arith.constant 3 : index
    %c0_5 = arith.constant 0 : index
    %4 = vector.load %arg4[%c3, %c0_5] : memref<4x32xf32, #tpu.memory_space<vmem>>, vector<1x32xf32>
    %c5 = arith.constant 5 : index
    %5 = memref.load %arg2[%c5] : memref<6xf32, #tpu.memory_space<smem>>
    %6 = vector.broadcast %5 : f32 to vector<16x32xf32>
    %7 = arith.mulf %0, %6 : vector<16x32xf32>
    %c4 = arith.constant 4 : index
    %8 = memref.load %arg2[%c4] : memref<6xf32, #tpu.memory_space<smem>>
    %9 = vector.broadcast %8 : f32 to vector<16x32xf32>
    %10 = arith.addf %7, %9 : vector<16x32xf32>
    %11 = arith.mulf %10, %0 : vector<16x32xf32>
    %c3_6 = arith.constant 3 : index
    %12 = memref.load %arg2[%c3_6] : memref<6xf32, #tpu.memory_space<smem>>
    %13 = vector.broadcast %12 : f32 to vector<16x32xf32>
    %14 = arith.addf %11, %13 : vector<16x32xf32>
    %15 = arith.mulf %14, %0 : vector<16x32xf32>
    %c2_7 = arith.constant 2 : index
    %16 = memref.load %arg2[%c2_7] : memref<6xf32, #tpu.memory_space<smem>>
    %17 = vector.broadcast %16 : f32 to vector<16x32xf32>
    %18 = arith.addf %15, %17 : vector<16x32xf32>
    %19 = arith.mulf %18, %0 : vector<16x32xf32>
    %c1_8 = arith.constant 1 : index
    %20 = memref.load %arg2[%c1_8] : memref<6xf32, #tpu.memory_space<smem>>
    %21 = vector.broadcast %20 : f32 to vector<16x32xf32>
    %22 = arith.addf %19, %21 : vector<16x32xf32>
    %23 = arith.mulf %22, %0 : vector<16x32xf32>
    %c0_9 = arith.constant 0 : index
    %24 = memref.load %arg2[%c0_9] : memref<6xf32, #tpu.memory_space<smem>>
    %25 = vector.broadcast %24 : f32 to vector<16x32xf32>
    %26 = arith.addf %23, %25 : vector<16x32xf32>
    %27 = vector.broadcast %4 : vector<1x32xf32> to vector<16x32xf32>
    %28 = arith.mulf %0, %27 : vector<16x32xf32>
    %29 = vector.broadcast %3 : vector<1x32xf32> to vector<16x32xf32>
    %30 = arith.addf %28, %29 : vector<16x32xf32>
    %31 = arith.mulf %30, %0 : vector<16x32xf32>
    %32 = vector.broadcast %2 : vector<1x32xf32> to vector<16x32xf32>
    %33 = arith.addf %31, %32 : vector<16x32xf32>
    %34 = arith.mulf %33, %0 : vector<16x32xf32>
    %35 = vector.broadcast %1 : vector<1x32xf32> to vector<16x32xf32>
    %36 = arith.addf %34, %35 : vector<16x32xf32>
    %37 = arith.mulf %36, %0 : vector<16x32xf32>
    %cst = arith.constant 1.000000e+00 : f32
    %38 = vector.broadcast %cst : f32 to vector<16x32xf32>
    %39 = arith.addf %37, %38 : vector<16x32xf32>
    %40 = tpu.reciprocal %39 {approx = true} : vector<16x32xf32> -> vector<16x32xf32>
    %41 = arith.mulf %39, %40 : vector<16x32xf32>
    %cst_10 = arith.constant 2.000000e+00 : f32
    %42 = vector.broadcast %cst_10 : f32 to vector<16x32xf32>
    %43 = arith.subf %42, %41 : vector<16x32xf32>
    %44 = arith.mulf %40, %43 : vector<16x32xf32>
    %45 = arith.mulf %26, %44 : vector<16x32xf32>
    %c0_11 = arith.constant 0 : index
    %c0_12 = arith.constant 0 : index
    %46 = vector.load %arg5[%c0_11, %c0_12] : memref<16x32xf32, #tpu.memory_space<vmem>>, vector<16x32xf32>
    tpu.vector_store %arg5[%c0_11, %c0_12], %45 {strides = array<i32>} : memref<16x32xf32, #tpu.memory_space<vmem>>, vector<16x32xf32>,
    return
  }
  func.func @transform_0(%arg0: i32, %arg1: i32) -> i32 {
    %c0_i32 = arith.constant 0 : i32
    %c0_i32_0 = arith.constant 0 : i32
    return %c0_i32 : i32
  }
  func.func @transform_1(%arg0: i32, %arg1: i32) -> (i32, i32) {
    %c0_i32 = arith.constant 0 : i32
    return %arg1, %arg0 : i32, i32
  }
  func.func @transform_2(%arg0: i32, %arg1: i32) -> (i32, i32) {
    %c0_i32 = arith.constant 0 : i32
    %c0_i32_0 = arith.constant 0 : i32
    return %c0_i32, %arg0 : i32, i32
  }
  func.func @transform_3(%arg0: i32, %arg1: i32) -> (i32, i32) {
    %c0_i32 = arith.constant 0 : i32
    return %arg1, %arg0 : i32, i32
  }
}

</mosaic_0001>

<bundles_post_ra>
// kernel: tpu_custom_call.1
= control target key start
LH: loop header
LB: loop body
LE: loop exit
PB: predicated region body
PF: predicated region fallthrough
CT: control target
= control target key end

     0   :  { %8 = vsyncpa [#allocation5], 0  ;;  %s298_s0 = inlined_call_operand.hbm [shape: f32[6], index: 0, kind: input, shape index: {}]   ;;  %s299_s1 = inlined_call_operand.hbm [shape: f32[16,32], index: 1, kind: input, shape index: {}]   ;;  %s300_s2 = inlined_call_operand.vmem [shape: f32[4,32], index: 2, kind: input, shape index: {}]   ;;  %s301_s3 = inlined_call_operand.hbm [shape: f32[16,32], index: 3, kind: output, shape index: {}]  }
   0x1   :  { %9 = vsyncpa [#allocation3], 0 }
   0x2   :  { %10 = vsyncpa [#allocation4], 0  ;;  %s159_s14 = scalar_lea.hbm %s298_s0, 16 }
   0x3   :  { %p160_p0 = scmp.ne.s32.totalorder %s298_s0, %s159_s14  ;;  %p163_p1 = scmp.lt.u32.totalorder %s159_s14, %s298_s0 }
   0x5   :  { %p165_p2 = pnand %p163_p1, %p160_p0 }
   0x7   :  { %168 = shalt.err (!%p165_p2)
}
   0x8   :  { %s219_s19 = smov [#allocation2]   ;;  %s220_s22 = smov [#allocation6]  }
   0x9   :  { %18 = dma.hbm_to_smem %s298_s0, 16, %s219_s19, [#allocation5]  }
   0xa   :  { %s24_s23 = sshll.u32 %s220_s22, 4  ;;  %s169_s26 = scalar_lea.hbm %s299_s1, 256  ;;  %s25_s23 = int_to_ptr.vmem [resolvable:$true] %s24_s23 }
   0xb   :  { %p170_p3 = scmp.ne.s32.totalorder %s299_s1, %s169_s26  ;;  %p173_p4 = scmp.lt.u32.totalorder %s169_s26, %s299_s1 }
   0xd   :  { %p175_p5 = pnand %p173_p4, %p170_p3 }
   0xf   :  { %178 = shalt.err (!%p175_p5)
}
  0x10   :  { %s179_s4 = scalar_lea.vmem %s25_s23, 256  ;;  %p184_p7 = scmp.lt.s32.totalorder %s25_s23, %s25_s23 }
  0x11   :  { %p180_p6 = scmp.ne.s32.totalorder %s25_s23, %s179_s4  ;;  %p185_p8 = scmp.lt.s32.totalorder %s179_s4, %s179_s4 }
  0x13   :  { %p186_p9 = por %p185_p8, %p184_p7 }
  0x15   :  { %p187_p10 = pnand %p186_p9, %p180_p6 }
  0x17   :  { %190 = shalt.err (!%p187_p10)
}
  0x18   :  { %s221_s0 = smov 128   ;;  %s222_s5 = smov 8  }
  0x19   :  { %30 = dma.hbm_to_vmem [thread:$0]  %s299_s1, 256, %s25_s23, [#allocation3], %s221_s0, %s221_s0, %s222_s5  }
  0x1a   :  { %213 = dma.done.wait [#allocation5], 16  }
  0x1b   :  { %214 = vsyncadd [#allocation5], 4294967280 }
  0x1c   :  { %215 = dma.done.wait [#allocation3], 256  }
  0x1d   :  { %216 = vsyncadd [#allocation3], 4294967040 }
  0x1e   :  { %39 = sfence }
  0x1f   :  { %v40_v0 = vld [vmem:[#allocation6] sm:$0xff]  ;;  %v147_v1 = vld [vmem:[%s300_s2 + $0x2] ss:$0 sm:$0xff]  ;;  %v146_v2 = vld [vmem:[%s300_s2 + $0x3] ss:$0 sm:$0xff]  ;;  %s141_s12 = sld [smem:[#allocation2 + $0x5]] }
  0x20   :  { %s142_s13 = sld [smem:[#allocation2 + $0x4]]  ;;  %v82_v3 = vmul.f32 %v146_v2, %v40_v0  ;;  %v41_v4 = vld [vmem:[#allocation6 + $0x8] sm:$0xff]  ;;  %s143_s14 = sld [smem:[#allocation2 + $0x3]]  ;;  %v148_v7 = vld [vmem:[%s300_s2 + $0x1] ss:$0 sm:$0xff]  ;;  %vm120_vm0 = vcmask 261120  }
  0x21   :  { %v83_v5 = vmul.f32 %v146_v2, %v41_v4  ;;  %s144_s16 = sld [smem:[#allocation2 + $0x2]]  ;;  %v149_v15 = vld [vmem:[%s300_s2] ss:$0 sm:$0xff]  ;;  %s145_s19 = sld [smem:[#allocation2 + $0x1]] }
  0x22   :  { %v88_v6 = vadd.f32 %v147_v1, %v82_v3  ;;  %s74_s2 = sld [smem:[#allocation2]]  ;;  %s223_s20 = smov [#allocation7]  }
  0x23   :  { %v89_v8 = vadd.f32 %v147_v1, %v83_v5  ;;  %s128_s21 = sshll.u32 %s223_s20, 4  ;;  %s129_s21 = int_to_ptr.vmem [resolvable:$true] %s128_s21 }
  0x24   :  { %v90_v9 = vmul.f32 %v88_v6, %v40_v0  ;;  %s191_s22 = scalar_lea.vmem %s129_s21, 256  ;;  %p196_p12 = scmp.lt.s32.totalorder %s129_s21, %s129_s21 }
  0x25   :  { %v47_v10 = vstv %s141_s12  ;;  %v91_v11 = vmul.f32 %v89_v8, %v41_v4  ;;  %p192_p11 = scmp.ne.s32.totalorder %s129_s21, %s191_s22  ;;  %p197_p13 = scmp.lt.s32.totalorder %s191_s22, %s191_s22 }
  0x26   :  { %v48_v12 = vmul.f32 %v47_v10, %v40_v0  ;;  %v51_v13 = vstv %s142_s13  ;;  %v96_v14 = vadd.f32 %v148_v7, %v90_v9  ;;  %v49_v16 = vmul.f32 %v47_v10, %v41_v4 }
  0x27   :  { %v97_v17 = vadd.f32 %v148_v7, %v91_v11  ;;  %v57_v20 = vstv %s143_s14  ;;  %v63_v29 = vstv %s144_s16  ;;  %v69_v39 = vstv %s145_s19  ;;  %p198_p0 = por %p197_p13, %p196_p12 }
  0x28   :  { %v52_v18 = vadd.f32 %v51_v13, %v48_v12  ;;  %v98_v19 = vmul.f32 %v96_v14, %v40_v0  ;;  %v53_v21 = vadd.f32 %v51_v13, %v49_v16  ;;  %v75_v45 = vstv %s74_s2 }
  0x29   :  { %v99_v22 = vmul.f32 %v97_v17, %v41_v4  ;;  %p199_p1 = pnand %p198_p0, %p192_p11 }
  0x2a   :  { %v54_v23 = vmul.f32 %v52_v18, %v40_v0  ;;  %v104_v24 = vadd.f32 %v149_v15, %v98_v19  ;;  %v55_v25 = vmul.f32 %v53_v21, %v41_v4 }
  0x2b   :  { %v105_v26 = vadd.f32 %v149_v15, %v99_v22 }
  0x2c   :  { %v58_v27 = vadd.f32 %v57_v20, %v54_v23  ;;  %v106_v28 = vmul.f32 %v104_v24, %v40_v0  ;;  %v59_v30 = vadd.f32 %v57_v20, %v55_v25 }
  0x2d   :  { %v107_v31 = vmul.f32 %v105_v26, %v41_v4 }
  0x2e   :  { %v60_v32 = vmul.f32 %v58_v27, %v40_v0  ;;  %v108_v33 = vadd.f32 1.0, %v106_v28  ;;  %v61_v34 = vmul.f32 %v59_v30, %v41_v4 }
  0x2f   :  { %v109_v35 = vadd.f32 1.0, %v107_v31 }
  0x30   :  { %v64_v36 = vadd.f32 %v63_v29, %v60_v32  ;;  %155 = vrcp.f32 %v108_v33  ;;  %v65_v37 = vadd.f32 %v63_v29, %v61_v34 }
  0x31   :  { %157 = vrcp.f32 %v109_v35 }
  0x32   :  { %v66_v38 = vmul.f32 %v64_v36, %v40_v0  ;;  %v67_v40 = vmul.f32 %v65_v37, %v41_v4 }
  0x34   :  { %v70_v41 = vadd.f32 %v69_v39, %v66_v38  ;;  %v71_v42 = vadd.f32 %v69_v39, %v67_v40 }
  0x36   :  { %v72_v43 = vmul.f32 %v70_v41, %v40_v0  ;;  %v73_v46 = vmul.f32 %v71_v42, %v41_v4 }
  0x38   :  { %v76_v50 = vadd.f32 %v75_v45, %v72_v43  ;;  %v77_v52 = vadd.f32 %v75_v45, %v73_v46 }
  0x3a   :  { %v156_v44 = vpop.eup %155 }
  0x3b   :  { %v158_v47 = vpop.eup %157  ;;  %v112_v48 = vmul.f32 %v156_v44, %v108_v33 }
  0x3c   :  { %v113_v49 = vmul.f32 %v158_v47, %v109_v35 }
  0x3d   :  { %v114_v51 = vsub.f32 2.0, %v112_v48 }
  0x3e   :  { %v115_v53 = vsub.f32 2.0, %v113_v49 }
  0x3f   :  { %v116_v54 = vmul.f32 %v156_v44, %v114_v51 }
  0x40   :  { %v117_v55 = vmul.f32 %v158_v47, %v115_v53 }
  0x41   :  { %v118_v56 = vmul.f32 %v116_v54, %v76_v50 }
  0x42   :  { %v119_v57 = vmul.f32 %v117_v55, %v77_v52 }
  0x43   :  { %121 = vst.msk [vmem:[#allocation7] sm:$0xff] %vm120_vm0, %v118_v56 }
  0x44   :  { %122 = vst.msk [vmem:[#allocation7 + $0x8] sm:$0xff] %vm120_vm0, %v119_v57 }
  0x45   :  { %202 = shalt.err (!%p199_p1)
}
  0x46   :  { %s203_s25 = scalar_lea.hbm %s301_s3, 256 }
  0x47   :  { %p204_p2 = scmp.ne.s32.totalorder %s301_s3, %s203_s25  ;;  %p207_p3 = scmp.lt.u32.totalorder %s203_s25, %s301_s3 }
  0x49   :  { %p209_p4 = pnand %p207_p3, %p204_p2 }
  0x4b   :  { %212 = shalt.err (!%p209_p4)
}
  0x4c   :  { %134 = dma.vmem_to_hbm [thread:$0]  %s129_s21, 256, %s301_s3, [#allocation4], %s221_s0, %s221_s0, %s222_s5  }
  0x4d   :  { %217 = dma.done.wait [#allocation4], 256  }
  0x4e   :  { %218 = vsyncadd [#allocation4], 4294967040 }
  0x4f   :  { %138 = vsyncpa [#allocation3], 1 }
  0x50   :  { %139 = vsyncpa [#allocation4], 1 }
  0x51   :  { %140 = vsyncpa [#allocation5], 1 }

</bundles_post_ra>
